<compile_context>
chip_gen: v7x
topology: tpu7x:2x2x1
jax: 0.10.0
libtpu: 0.0.40
codegen_flags: <defaults>
</compile_context>

<pallas_src>
import functools

import jax
import jax.numpy as jnp
from jax import lax
from jax.experimental import pallas as pl
from jax.experimental.pallas import tpu as pltpu


def _vreg_accumulate(x, acc_ref):
    """Fold a (tq, tk) f32 tile into acc_ref using only VALU vreg adds.

    acc_ref is (8, 128) on the tiled path (one vreg): sublane-blocks then
    lane-blocks are folded with static, tile-aligned slices, so no per-step
    XLU cross-lane reduction occurs.  On the tiny single-block path acc_ref is
    (1, 1) and a plain full reduce is used (perf-irrelevant there).
    """
    if acc_ref.shape == (1, 1):
        acc_ref[...] += jnp.sum(x, keepdims=True)
        return
    r, c = acc_ref.shape
    tq, tk = x.shape
    rows = x[0:r, :]
    for bi in range(1, tq // r):                    # (tq, tk) -> (r, tk)
        rows = rows + x[bi * r:(bi + 1) * r, :]
    tile = rows[:, 0:c]
    for bj in range(1, tk // c):                    # (r, tk) -> (r, c)
        tile = tile + rows[:, bj * c:(bj + 1) * c]
    acc_ref[...] += tile


def _circle_block_kernel(bi_ref, bj_ref, frow_ref, fcol_ref, lrow_ref,
                         lcol_ref, loss_ref, acc_p_ref, acc_n_ref, *,
                         scale, margin, tq, tk, m_valid, padded):
    t = pl.program_id(0)
    i = bi_ref[t]          # block row index (from the upper-triangle table)
    j = bj_ref[t]          # block col index

    @pl.when(t == 0)
    def _init():
        acc_p_ref[...] = jnp.zeros_like(acc_p_ref)
        acc_n_ref[...] = jnp.zeros_like(acc_n_ref)
        loss_ref[...] = jnp.zeros_like(loss_ref)

    fr = frow_ref[...]     # (tq, d)  already L2-normalized in the wrapper
    fc = fcol_ref[...]     # (tk, d)

    # sim block = rows @ cols^T, contraction on the feature dim (no transpose).
    sim = lax.dot_general(fr, fc,
                          dimension_numbers=(((1,), (1,)), ((), ())),
                          preferred_element_type=jnp.float32)    # (tq, tk) f32

    same = lrow_ref[...] == lcol_ref[...]       # (tq,1)==(1,tk) -> (tq,tk)

    s = jnp.float32(scale)
    one_plus_m = jnp.float32(1.0 + margin)
    margin_p = jnp.float32(1.0 - margin)
    margin_n = jnp.float32(margin)

    # Fused single exp per element (one EUP push instead of two).
    arg_p = (-s) * jnp.maximum(one_plus_m - sim, 0.0) * (sim - margin_p)
    arg_n = s * jnp.maximum(sim + margin_n, 0.0) * (sim - margin_n)
    e = jnp.exp(jnp.where(same, arg_p, arg_n))

    # Interior blocks (strictly above the diagonal and fully inside the valid
    # range) need no triangle / padding mask at all.
    is_interior = (i + 1) * tq <= j * tk
    if padded:
        is_interior = jnp.logical_and(is_interior, (j + 1) * tk <= m_valid)

    @pl.when(is_interior)
    def _fast():
        _vreg_accumulate(jnp.where(same, e, 0.0), acc_p_ref)
        _vreg_accumulate(jnp.where(same, 0.0, e), acc_n_ref)

    @pl.when(jnp.logical_not(is_interior))
    def _masked():
        grow = i * tq + lax.broadcasted_iota(jnp.int32, (tq, tk), 0)
        gcol = j * tk + lax.broadcasted_iota(jnp.int32, (tq, tk), 1)
        valid = grow < gcol                               # triu(diagonal=1)
        if padded:
            # grow < gcol < m_valid, so masking the column index suffices.
            valid = jnp.logical_and(valid, gcol < m_valid)
        _vreg_accumulate(
            jnp.where(jnp.logical_and(same, valid), e, 0.0), acc_p_ref)
        _vreg_accumulate(
            jnp.where(jnp.logical_and(jnp.logical_not(same), valid), e, 0.0),
            acc_n_ref)

    @pl.when(t == pl.num_programs(0) - 1)
    def _finalize():
        loss_p = jnp.sum(acc_p_ref[...], keepdims=True)   # single XLU reduce
        loss_n = jnp.sum(acc_n_ref[...], keepdims=True)
        loss_ref[...] = jnp.log(1.0 + loss_p * loss_n)


def circle_loss2(feats, labels, scale=32.0, margin=0.25, block=512,
                 mxu_bf16=False):
    """feats: (m, d) float, labels: (m,) int -> scalar float32 loss.

    block=512 is sized for v5e/v6e (128 MiB VMEM); it also fits v7x's 32 MiB
    default scoped VMEM (~1 MiB per live (512,512) f32 temp) since column
    feats are streamed, not resident.
    """
    m, d = feats.shape
    assert labels.shape[0] == m, (feats.shape, labels.shape)

    labels = labels.astype(jnp.int32)

    # Hoisted L2 normalization (F.normalize(p=2, dim=1, eps=1e-12)): one XLA
    # pass over (m, d) instead of once per visited block inside the kernel.
    f32 = feats.astype(jnp.float32)
    nrm = jnp.sqrt(jnp.sum(f32 * f32, axis=1, keepdims=True))
    feats_n = f32 / jnp.maximum(nrm, 1e-12)
    if mxu_bf16:
        # bf16 MXU operands (v6e/v7x native); also halves feats HBM/VMEM
        # traffic.  Elementwise math stays f32.  Opt-in for tolerance.
        feats_n = feats_n.astype(jnp.bfloat16)

    if m <= block:
        # Single block per axis: block dims == full dims, no padding required.
        tq = tk = m
        m_pad = m
        feats_p = feats_n
        labels_p = labels
        vreg_acc = False        # tile may not be (8,128)-divisible; tiny anyway
    else:
        assert block % 128 == 0, "tile must be a multiple of 128 when m > block"
        tq = tk = block
        m_pad = ((m + block - 1) // block) * block
        pad = m_pad - m
        feats_p = jnp.pad(feats_n, ((0, pad), (0, 0)))
        labels_p = jnp.pad(labels, (0, pad), constant_values=-1)
        vreg_acc = True

    # Wrapper-side layouts (free in XLA) so the kernel never relayouts labels.
    labels_col = labels_p.reshape(m_pad, 1)   # row-block labels
    labels_row = labels_p.reshape(1, m_pad)   # col-block labels, lane-dense

    # Enumerate only blocks intersecting the strict upper triangle; scalar
    # prefetch feeds the (i, j) table to the index_maps (1-D SMEM arrays).
    nq, nk = m_pad // tq, m_pad // tk
    pairs = [(i, j) for i in range(nq) for j in range(nk)
             if i * tq < (j + 1) * tk]
    n_blocks = len(pairs)
    blk_i = jnp.asarray([p[0] for p in pairs], dtype=jnp.int32)
    blk_j = jnp.asarray([p[1] for p in pairs], dtype=jnp.int32)

    acc_shape = (8, 128) if vreg_acc else (1, 1)

    kernel = functools.partial(
        _circle_block_kernel,
        scale=float(scale), margin=float(margin),
        tq=tq, tk=tk, m_valid=m, padded=(m_pad > m))

    itemsize = feats_p.dtype.itemsize
    cost = pl.CostEstimate(
        flops=n_blocks * (2 * tq * tk * d + 10 * tq * tk),
        transcendentals=n_blocks * tq * tk,
        bytes_accessed=(nq * tq * d + n_blocks * tk * d) * itemsize
                       + (nq * tq + n_blocks * tk) * 4 + 4)

    out = pl.pallas_call(
        kernel,
        out_shape=jax.ShapeDtypeStruct((1, 1), jnp.float32),
        grid_spec=pltpu.PrefetchScalarGridSpec(
            num_scalar_prefetch=2,
            grid=(n_blocks,),
            in_specs=[
                pl.BlockSpec((tq, d), lambda t, bi, bj: (bi[t], 0)),  # row feats
                pl.BlockSpec((tk, d), lambda t, bi, bj: (bj[t], 0)),  # col feats
                pl.BlockSpec((tq, 1), lambda t, bi, bj: (bi[t], 0)),  # labels col
                pl.BlockSpec((1, tk), lambda t, bi, bj: (0, bj[t])),  # labels row
            ],
            out_specs=pl.BlockSpec((1, 1), lambda t, bi, bj: (0, 0)),
            scratch_shapes=[pltpu.VMEM(acc_shape, jnp.float32),   # loss_p acc
                            pltpu.VMEM(acc_shape, jnp.float32)],  # loss_n acc
        ),
        compiler_params=pltpu.CompilerParams(
            dimension_semantics=("arbitrary",),
            vmem_limit_bytes=32 * 1024 * 1024,
        ),
        cost_estimate=cost,
    )(blk_i, blk_j, feats_p, feats_p, labels_col, labels_row)
    return out[0, 0]


def _reference(feats, labels, scale=32.0, margin=0.25):
    # Pure-JAX reference mirroring the PyTorch module.
    f = feats.astype(jnp.float32)
    f = f / jnp.maximum(jnp.linalg.norm(f, axis=1, keepdims=True), 1e-12)
    sim = jnp.dot(f, f.T, precision=lax.Precision.HIGHEST)
    m = labels.shape[0]
    same = labels[:, None] == labels[None, :]
    upper = jnp.triu(jnp.ones((m, m), bool), k=1)
    pos_mask = same & upper
    neg_mask = (~same) & upper
    alpha_p = jnp.maximum(-sim + 1.0 + margin, 0.0)
    alpha_n = jnp.maximum(sim + margin, 0.0)
    term_p = jnp.exp(-scale * alpha_p * (sim - (1.0 - margin)))
    term_n = jnp.exp(scale * alpha_n * (sim - margin))
    loss_p = jnp.sum(jnp.where(pos_mask, term_p, 0.0))
    loss_n = jnp.sum(jnp.where(neg_mask, term_n, 0.0))
    return jnp.log(1.0 + loss_p * loss_n)


if __name__ == "__main__":
    key = jax.random.PRNGKey(0)
    k1, k2, k3, k4 = jax.random.split(key, 4)

    # Small single-block case (typical tiny batch of embeddings).
    m, d = 8, 32
    feats = jax.random.normal(k1, (m, d), dtype=jnp.float32)
    labels = jax.random.randint(k2, (m,), 0, 4, dtype=jnp.int32)
    loss = jax.block_until_ready(circle_loss2(feats, labels, scale=32.0, margin=0.25))
    ref = jax.block_until_ready(_reference(feats, labels))
    assert jnp.allclose(loss, ref, rtol=1e-4, atol=1e-4), (loss, ref)

    # Larger case exercising the triangular block list, padding, vreg
    # accumulators and the interior/masked split.
    m2, d2 = 300, 64
    feats2 = jax.random.normal(k3, (m2, d2), dtype=jnp.float32)
    labels2 = jax.random.randint(k4, (m2,), 0, 16, dtype=jnp.int32)
    loss2 = jax.block_until_ready(circle_loss2(feats2, labels2, block=256))
    ref2 = jax.block_until_ready(_reference(feats2, labels2))
    assert jnp.allclose(loss2, ref2, rtol=2e-3, atol=2e-3), (loss2, ref2)

    print("KERNEL_OK")
</pallas_src>

<mosaic_0001>
module attributes {stable_mosaic.version = 11 : i64} {
  func.func @_circle_block_kernel(%arg0: i32, %arg1: memref<1xi32, #tpu.memory_space<smem>>, %arg2: memref<1xi32, #tpu.memory_space<smem>>, %arg3: memref<8x32xf32, #tpu.memory_space<vmem>>, %arg4: memref<8x32xf32, #tpu.memory_space<vmem>>, %arg5: memref<8x1xi32, #tpu.memory_space<vmem>>, %arg6: memref<1x8xi32, #tpu.memory_space<vmem>>, %arg7: memref<1x1xf32, #tpu.memory_space<vmem>>, %arg8: memref<1x1xf32, #tpu.memory_space<vmem>>, %arg9: memref<1x1xf32, #tpu.memory_space<vmem>>) attributes {dimension_semantics = [#tpu.dimension_semantics<arbitrary>], iteration_bounds = array<i64: 1>, scalar_prefetch = 2 : i64, scratch_operands = 2 : i64, tpu.core_type = #tpu.core_type<tc>, window_params = [{transform_indices = @transform_0, window_bounds = array<i64: 8, 32>}, {transform_indices = @transform_1, window_bounds = array<i64: 8, 32>}, {transform_indices = @transform_2, window_bounds = array<i64: 8, 1>}, {transform_indices = @transform_3, window_bounds = array<i64: 1, 8>}, {pipeline_mode = #tpu.pipeline_mode<synchronous>, transform_indices = @transform_4, window_bounds = array<i64: 1, 1>}]} {
    %0 = arith.index_cast %arg0 : i32 to index
    %1 = memref.load %arg1[%0] : memref<1xi32, #tpu.memory_space<smem>>
    %2 = arith.index_cast %arg0 : i32 to index
    %3 = memref.load %arg2[%2] : memref<1xi32, #tpu.memory_space<smem>>
    %c0_i32 = arith.constant 0 : i32
    %4 = arith.cmpi eq, %arg0, %c0_i32 : i32
    %5 = arith.extui %4 : i1 to i32
    %c0_i32_0 = arith.constant 0 : i32
    %6 = arith.cmpi ne, %5, %c0_i32_0 : i32
    scf.if %6 {
      %cst_22 = arith.constant 0.000000e+00 : f32
      %48 = vector.broadcast %cst_22 : f32 to vector<1x1xf32>
      %c0_23 = arith.constant 0 : index
      %c0_24 = arith.constant 0 : index
      %49 = vector.load %arg8[%c0_23, %c0_24] : memref<1x1xf32, #tpu.memory_space<vmem>>, vector<1x1xf32>
      tpu.vector_store %arg8[%c0_23, %c0_24], %48 {strides = array<i32>} : memref<1x1xf32, #tpu.memory_space<vmem>>, vector<1x1xf32>,
      %cst_25 = arith.constant 0.000000e+00 : f32
      %50 = vector.broadcast %cst_25 : f32 to vector<1x1xf32>
      %c0_26 = arith.constant 0 : index
      %c0_27 = arith.constant 0 : index
      %51 = vector.load %arg9[%c0_26, %c0_27] : memref<1x1xf32, #tpu.memory_space<vmem>>, vector<1x1xf32>
      tpu.vector_store %arg9[%c0_26, %c0_27], %50 {strides = array<i32>} : memref<1x1xf32, #tpu.memory_space<vmem>>, vector<1x1xf32>,
      %cst_28 = arith.constant 0.000000e+00 : f32
      %52 = vector.broadcast %cst_28 : f32 to vector<1x1xf32>
      %c0_29 = arith.constant 0 : index
      %c0_30 = arith.constant 0 : index
      %53 = vector.load %arg7[%c0_29, %c0_30] : memref<1x1xf32, #tpu.memory_space<vmem>>, vector<1x1xf32>
      tpu.vector_store %arg7[%c0_29, %c0_30], %52 {strides = array<i32>} : memref<1x1xf32, #tpu.memory_space<vmem>>, vector<1x1xf32>,
    } else {
    }
    %c0 = arith.constant 0 : index
    %c0_1 = arith.constant 0 : index
    %7 = vector.load %arg3[%c0, %c0_1] : memref<8x32xf32, #tpu.memory_space<vmem>>, vector<8x32xf32>
    %c0_2 = arith.constant 0 : index
    %c0_3 = arith.constant 0 : index
    %8 = vector.load %arg4[%c0_2, %c0_3] : memref<8x32xf32, #tpu.memory_space<vmem>>, vector<8x32xf32>
    %cst = arith.constant dense<0.000000e+00> : vector<8x8xf32>
    %9 = tpu.matmul %7, %8, %cst {dimension_numbers = #tpu.dot_dimension_numbers<[1], [1], [0], [0], [0, 0, 1, 0], [], []>} : vector<8x32xf32>, vector<8x32xf32>, vector<8x8xf32> -> vector<8x8xf32>
    %c0_4 = arith.constant 0 : index
    %c0_5 = arith.constant 0 : index
    %10 = vector.load %arg5[%c0_4, %c0_5] : memref<8x1xi32, #tpu.memory_space<vmem>>, vector<8x1xi32>
    %c0_6 = arith.constant 0 : index
    %c0_7 = arith.constant 0 : index
    %11 = vector.load %arg6[%c0_6, %c0_7] : memref<1x8xi32, #tpu.memory_space<vmem>>, vector<1x8xi32>
    %12 = vector.broadcast %10 : vector<8x1xi32> to vector<8x8xi32>
    %13 = vector.broadcast %11 : vector<1x8xi32> to vector<8x8xi32>
    %14 = arith.cmpi eq, %12, %13 : vector<8x8xi32>
    %cst_8 = arith.constant 0.000000e+00 : f32
    %cst_9 = arith.constant 3.200000e+01 : f32
    %15 = arith.subf %cst_8, %cst_9 : f32
    %cst_10 = arith.constant 1.250000e+00 : f32
    %16 = vector.broadcast %cst_10 : f32 to vector<8x8xf32>
    %17 = arith.subf %16, %9 : vector<8x8xf32>
    %cst_11 = arith.constant 0.000000e+00 : f32
    %18 = vector.broadcast %cst_11 : f32 to vector<8x8xf32>
    %19 = arith.maximumf %17, %18 : vector<8x8xf32>
    %20 = vector.broadcast %15 : f32 to vector<8x8xf32>
    %21 = arith.mulf %20, %19 : vector<8x8xf32>
    %cst_12 = arith.constant 7.500000e-01 : f32
    %22 = vector.broadcast %cst_12 : f32 to vector<8x8xf32>
    %23 = arith.subf %9, %22 : vector<8x8xf32>
    %24 = arith.mulf %21, %23 : vector<8x8xf32>
    %cst_13 = arith.constant 2.500000e-01 : f32
    %25 = vector.broadcast %cst_13 : f32 to vector<8x8xf32>
    %26 = arith.addf %9, %25 : vector<8x8xf32>
    %cst_14 = arith.constant 0.000000e+00 : f32
    %27 = vector.broadcast %cst_14 : f32 to vector<8x8xf32>
    %28 = arith.maximumf %26, %27 : vector<8x8xf32>
    %cst_15 = arith.constant 3.200000e+01 : f32
    %29 = vector.broadcast %cst_15 : f32 to vector<8x8xf32>
    %30 = arith.mulf %29, %28 : vector<8x8xf32>
    %cst_16 = arith.constant 2.500000e-01 : f32
    %31 = vector.broadcast %cst_16 : f32 to vector<8x8xf32>
    %32 = arith.subf %9, %31 : vector<8x8xf32>
    %33 = arith.mulf %30, %32 : vector<8x8xf32>
    %34 = arith.select %14, %24, %33 : vector<8x8xi1>, vector<8x8xf32>
    %35 = math.exp %34 : vector<8x8xf32>
    %c1_i32 = arith.constant 1 : i32
    %36 = arith.addi %1, %c1_i32 : i32
    %c8_i32 = arith.constant 8 : i32
    %37 = arith.muli %36, %c8_i32 : i32
    %c8_i32_17 = arith.constant 8 : i32
    %38 = arith.muli %3, %c8_i32_17 : i32
    %39 = arith.cmpi sle, %37, %38 : i32
    %40 = arith.extui %39 : i1 to i32
    %c0_i32_18 = arith.constant 0 : i32
    %41 = arith.cmpi ne, %40, %c0_i32_18 : i32
    scf.if %41 {
      %cst_22 = arith.constant 0.000000e+00 : f32
      %48 = vector.broadcast %cst_22 : f32 to vector<8x8xf32>
      %49 = arith.select %14, %35, %48 : vector<8x8xi1>, vector<8x8xf32>
      %c0_23 = arith.constant 0 : index
      %c0_24 = arith.constant 0 : index
      %50 = vector.load %arg8[%c0_23, %c0_24] : memref<1x1xf32, #tpu.memory_space<vmem>>, vector<1x1xf32>
      %51 = vector.shape_cast %49 : vector<8x8xf32> to vector<1x8x8xf32>
      %cst_25 = arith.constant dense<0.000000e+00> : vector<1xf32>
      %52 = vector.multi_reduction <add>, %51, %cst_25 [1, 2] : vector<1x8x8xf32> to vector<1xf32>
      %53 = vector.shape_cast %52 : vector<1xf32> to vector<1x1x1xf32>
      %54 = vector.extract %53[0, 0, 0] : f32 from vector<1x1x1xf32>
      %55 = vector.broadcast %54 : f32 to vector<1x1xf32>
      %56 = arith.addf %50, %55 : vector<1x1xf32>
      %c0_26 = arith.constant 0 : index
      %c0_27 = arith.constant 0 : index
      %57 = vector.load %arg8[%c0_26, %c0_27] : memref<1x1xf32, #tpu.memory_space<vmem>>, vector<1x1xf32>
      tpu.vector_store %arg8[%c0_26, %c0_27], %56 {strides = array<i32>} : memref<1x1xf32, #tpu.memory_space<vmem>>, vector<1x1xf32>,
      %cst_28 = arith.constant 0.000000e+00 : f32
      %58 = vector.broadcast %cst_28 : f32 to vector<8x8xf32>
      %59 = arith.select %14, %58, %35 : vector<8x8xi1>, vector<8x8xf32>
      %c0_29 = arith.constant 0 : index
      %c0_30 = arith.constant 0 : index
      %60 = vector.load %arg9[%c0_29, %c0_30] : memref<1x1xf32, #tpu.memory_space<vmem>>, vector<1x1xf32>
      %61 = vector.shape_cast %59 : vector<8x8xf32> to vector<1x8x8xf32>
      %cst_31 = arith.constant dense<0.000000e+00> : vector<1xf32>
      %62 = vector.multi_reduction <add>, %61, %cst_31 [1, 2] : vector<1x8x8xf32> to vector<1xf32>
      %63 = vector.shape_cast %62 : vector<1xf32> to vector<1x1x1xf32>
      %64 = vector.extract %63[0, 0, 0] : f32 from vector<1x1x1xf32>
      %65 = vector.broadcast %64 : f32 to vector<1x1xf32>
      %66 = arith.addf %60, %65 : vector<1x1xf32>
      %c0_32 = arith.constant 0 : index
      %c0_33 = arith.constant 0 : index
      %67 = vector.load %arg9[%c0_32, %c0_33] : memref<1x1xf32, #tpu.memory_space<vmem>>, vector<1x1xf32>
      tpu.vector_store %arg9[%c0_32, %c0_33], %66 {strides = array<i32>} : memref<1x1xf32, #tpu.memory_space<vmem>>, vector<1x1xf32>,
    } else {
    }
    %true = arith.constant true
    %42 = arith.xori %39, %true : i1
    %43 = arith.extui %42 : i1 to i32
    %c0_i32_19 = arith.constant 0 : i32
    %44 = arith.cmpi ne, %43, %c0_i32_19 : i32
    scf.if %44 {
      %c8_i32_22 = arith.constant 8 : i32
      %48 = arith.muli %1, %c8_i32_22 : i32
      %49 = tpu.iota {dimensions = array<i32: 0>} : vector<8x8xi32>
      %50 = vector.broadcast %48 : i32 to vector<8x8xi32>
      %51 = arith.addi %50, %49 : vector<8x8xi32>
      %c8_i32_23 = arith.constant 8 : i32
      %52 = arith.muli %3, %c8_i32_23 : i32
      %53 = tpu.iota {dimensions = array<i32: 1>} : vector<8x8xi32>
      %54 = vector.broadcast %52 : i32 to vector<8x8xi32>
      %55 = arith.addi %54, %53 : vector<8x8xi32>
      %56 = arith.cmpi slt, %51, %55 : vector<8x8xi32>
      %57 = arith.andi %14, %56 : vector<8x8xi1>
      %cst_24 = arith.constant 0.000000e+00 : f32
      %58 = vector.broadcast %cst_24 : f32 to vector<8x8xf32>
      %59 = arith.select %57, %35, %58 : vector<8x8xi1>, vector<8x8xf32>
      %c0_25 = arith.constant 0 : index
      %c0_26 = arith.constant 0 : index
      %60 = vector.load %arg8[%c0_25, %c0_26] : memref<1x1xf32, #tpu.memory_space<vmem>>, vector<1x1xf32>
      %61 = vector.shape_cast %59 : vector<8x8xf32> to vector<1x8x8xf32>
      %cst_27 = arith.constant dense<0.000000e+00> : vector<1xf32>
      %62 = vector.multi_reduction <add>, %61, %cst_27 [1, 2] : vector<1x8x8xf32> to vector<1xf32>
      %63 = vector.shape_cast %62 : vector<1xf32> to vector<1x1x1xf32>
      %64 = vector.extract %63[0, 0, 0] : f32 from vector<1x1x1xf32>
      %65 = vector.broadcast %64 : f32 to vector<1x1xf32>
      %66 = arith.addf %60, %65 : vector<1x1xf32>
      %c0_28 = arith.constant 0 : index
      %c0_29 = arith.constant 0 : index
      %67 = vector.load %arg8[%c0_28, %c0_29] : memref<1x1xf32, #tpu.memory_space<vmem>>, vector<1x1xf32>
      tpu.vector_store %arg8[%c0_28, %c0_29], %66 {strides = array<i32>} : memref<1x1xf32, #tpu.memory_space<vmem>>, vector<1x1xf32>,
      %cst_30 = arith.constant dense<true> : vector<8x8xi1>
      %68 = arith.xori %14, %cst_30 : vector<8x8xi1>
      %69 = arith.andi %68, %56 : vector<8x8xi1>
      %cst_31 = arith.constant 0.000000e+00 : f32
      %70 = vector.broadcast %cst_31 : f32 to vector<8x8xf32>
      %71 = arith.select %69, %35, %70 : vector<8x8xi1>, vector<8x8xf32>
      %c0_32 = arith.constant 0 : index
      %c0_33 = arith.constant 0 : index
      %72 = vector.load %arg9[%c0_32, %c0_33] : memref<1x1xf32, #tpu.memory_space<vmem>>, vector<1x1xf32>
      %73 = vector.shape_cast %71 : vector<8x8xf32> to vector<1x8x8xf32>
      %cst_34 = arith.constant dense<0.000000e+00> : vector<1xf32>
      %74 = vector.multi_reduction <add>, %73, %cst_34 [1, 2] : vector<1x8x8xf32> to vector<1xf32>
      %75 = vector.shape_cast %74 : vector<1xf32> to vector<1x1x1xf32>
      %76 = vector.extract %75[0, 0, 0] : f32 from vector<1x1x1xf32>
      %77 = vector.broadcast %76 : f32 to vector<1x1xf32>
      %78 = arith.addf %72, %77 : vector<1x1xf32>
      %c0_35 = arith.constant 0 : index
      %c0_36 = arith.constant 0 : index
      %79 = vector.load %arg9[%c0_35, %c0_36] : memref<1x1xf32, #tpu.memory_space<vmem>>, vector<1x1xf32>
      tpu.vector_store %arg9[%c0_35, %c0_36], %78 {strides = array<i32>} : memref<1x1xf32, #tpu.memory_space<vmem>>, vector<1x1xf32>,
    } else {
    }
    %c0_i32_20 = arith.constant 0 : i32
    %45 = arith.cmpi eq, %arg0, %c0_i32_20 : i32
    %46 = arith.extui %45 : i1 to i32
    %c0_i32_21 = arith.constant 0 : i32
    %47 = arith.cmpi ne, %46, %c0_i32_21 : i32
    scf.if %47 {
      %c0_22 = arith.constant 0 : index
      %c0_23 = arith.constant 0 : index
      %48 = vector.load %arg8[%c0_22, %c0_23] : memref<1x1xf32, #tpu.memory_space<vmem>>, vector<1x1xf32>
      %49 = vector.shape_cast %48 : vector<1x1xf32> to vector<1x1x1xf32>
      %cst_24 = arith.constant dense<0.000000e+00> : vector<1xf32>
      %50 = vector.multi_reduction <add>, %49, %cst_24 [1, 2] : vector<1x1x1xf32> to vector<1xf32>
      %51 = vector.shape_cast %50 : vector<1xf32> to vector<1x1x1xf32>
      %52 = vector.extract %51[0, 0, 0] : f32 from vector<1x1x1xf32>
      %53 = vector.broadcast %52 : f32 to vector<1x1xf32>
      %c0_25 = arith.constant 0 : index
      %c0_26 = arith.constant 0 : index
      %54 = vector.load %arg9[%c0_25, %c0_26] : memref<1x1xf32, #tpu.memory_space<vmem>>, vector<1x1xf32>
      %55 = vector.shape_cast %54 : vector<1x1xf32> to vector<1x1x1xf32>
      %cst_27 = arith.constant dense<0.000000e+00> : vector<1xf32>
      %56 = vector.multi_reduction <add>, %55, %cst_27 [1, 2] : vector<1x1x1xf32> to vector<1xf32>
      %57 = vector.shape_cast %56 : vector<1xf32> to vector<1x1x1xf32>
      %58 = vector.extract %57[0, 0, 0] : f32 from vector<1x1x1xf32>
      %59 = vector.broadcast %58 : f32 to vector<1x1xf32>
      %60 = arith.mulf %53, %59 : vector<1x1xf32>
      %cst_28 = arith.constant 1.000000e+00 : f32
      %61 = vector.broadcast %cst_28 : f32 to vector<1x1xf32>
      %62 = arith.addf %61, %60 : vector<1x1xf32>
      %63 = math.log %62 : vector<1x1xf32>
      %c0_29 = arith.constant 0 : index
      %c0_30 = arith.constant 0 : index
      %64 = vector.load %arg7[%c0_29, %c0_30] : memref<1x1xf32, #tpu.memory_space<vmem>>, vector<1x1xf32>
      tpu.vector_store %arg7[%c0_29, %c0_30], %63 {strides = array<i32>} : memref<1x1xf32, #tpu.memory_space<vmem>>, vector<1x1xf32>,
    } else {
    }
    return
  }
  func.func @transform_0(%arg0: i32, %arg1: memref<1xi32, #tpu.memory_space<smem>>, %arg2: memref<1xi32, #tpu.memory_space<smem>>) -> (i32, i32) {
    %0 = arith.index_cast %arg0 : i32 to index
    %1 = memref.load %arg1[%0] : memref<1xi32, #tpu.memory_space<smem>>
    %c0_i32 = arith.constant 0 : i32
    %c0_i32_0 = arith.constant 0 : i32
    return %1, %c0_i32 : i32, i32
  }
  func.func @transform_1(%arg0: i32, %arg1: memref<1xi32, #tpu.memory_space<smem>>, %arg2: memref<1xi32, #tpu.memory_space<smem>>) -> (i32, i32) {
    %0 = arith.index_cast %arg0 : i32 to index
    %1 = memref.load %arg2[%0] : memref<1xi32, #tpu.memory_space<smem>>
    %c0_i32 = arith.constant 0 : i32
    %c0_i32_0 = arith.constant 0 : i32
    return %1, %c0_i32 : i32, i32
  }
  func.func @transform_2(%arg0: i32, %arg1: memref<1xi32, #tpu.memory_space<smem>>, %arg2: memref<1xi32, #tpu.memory_space<smem>>) -> (i32, i32) {
    %0 = arith.index_cast %arg0 : i32 to index
    %1 = memref.load %arg1[%0] : memref<1xi32, #tpu.memory_space<smem>>
    %c0_i32 = arith.constant 0 : i32
    %c0_i32_0 = arith.constant 0 : i32
    return %1, %c0_i32 : i32, i32
  }
  func.func @transform_3(%arg0: i32, %arg1: memref<1xi32, #tpu.memory_space<smem>>, %arg2: memref<1xi32, #tpu.memory_space<smem>>) -> (i32, i32) {
    %0 = arith.index_cast %arg0 : i32 to index
    %1 = memref.load %arg2[%0] : memref<1xi32, #tpu.memory_space<smem>>
    %c0_i32 = arith.constant 0 : i32
    %c0_i32_0 = arith.constant 0 : i32
    return %c0_i32, %1 : i32, i32
  }
  func.func @transform_4(%arg0: i32, %arg1: memref<1xi32, #tpu.memory_space<smem>>, %arg2: memref<1xi32, #tpu.memory_space<smem>>) -> (i32, i32) {
    %c0_i32 = arith.constant 0 : i32
    %c0_i32_0 = arith.constant 0 : i32
    %c0_i32_1 = arith.constant 0 : i32
    return %c0_i32, %c0_i32_0 : i32, i32
  }
}

</mosaic_0001>

<bundles_post_ra>
// kernel: tpu_custom_call.1
= control target key start
LH: loop header
LB: loop body
LE: loop exit
PB: predicated region body
PF: predicated region fallthrough
CT: control target
= control target key end

     0   :  { %13 = vsyncpa [#allocation8], 0  ;;  %vm93_vm0 = vcmask 0   ;;  %v407_v0 = vmov 0.0   ;;  %vm408_vm1 = vmmov 0   ;;  %v409_v1 = vmov 0   ;;  %s528_s0 = inlined_call_operand.<no memory space> [shape: s32[1], index: 0, kind: input, shape index: {}]   ;;  %s529_s1 = inlined_call_operand.<no memory space> [shape: s32[1], index: 1, kind: input, shape index: {}]   ;;  %s530_s2 = inlined_call_operand.vmem [shape: f32[8,32], index: 2, kind: input, shape index: {}]   ;;  %s531_s3 = inlined_call_operand.vmem [shape: f32[8,32], index: 3, kind: input, shape index: {}]   ;;  %s532_s4 = inlined_call_operand.vmem [shape: s32[8,1], index: 4, kind: input, shape index: {}]   ;;  %s533_s5 = inlined_call_operand.vmem [shape: s32[1,8], index: 5, kind: input, shape index: {}]   ;;  %s534_s6 = inlined_call_operand.hbm [shape: f32[1,1], index: 6, kind: output, shape index: {}]  }
   0x1   :  { %p71_p0 = scmp.lt.s32.totalorder %s529_s1, 0  ;;  %94 = vst.msk [vmem:[#allocation2] sm:$0x1] %vm93_vm0, %v407_v0  ;;  %95 = vst.msk [vmem:[#allocation3] sm:$0x1] %vm93_vm0, %v407_v0  ;;  %356 = vmatprep.subr.mxu0 %v407_v0  ;;  %p65_p1 = scmp.lt.s32.totalorder %s528_s0, 0  ;;  %358 = vmatprep.mubr.msk.f32.mxu0 %vm408_vm1, %v407_v0 }
   0x2   :  { %96 = vst.msk [vmem:[#allocation7] sm:$0x1] %vm93_vm0, %v407_v0  ;;  %378 = vset.pattern.permute.xlu0 %v409_v1  ;;  %vm99_vm2 = vcmask 261120   ;;  %s352_s20 = sshll.u32 %s528_s0, 3  ;;  %s483_s24 = sshll.u32 %s529_s1, 3 }
   0x3   :  { %s72_s27 = scalar_select %p71_p0, %s529_s1, 0 }
   0x4   :  { %s66_s30 = scalar_select %p65_p1, %s528_s0, 0 }
   0x5   :  { %s340_s7 = sshll.u32 %s72_s27, 3  ;;  %s478_s22 = sadd.s32 8, %s352_s20 }
   0x6   :  { %s74_s10 = scalar_lea.vmem %s531_s3, %s340_s7  ;;  %s339_s11 = sshll.u32 %s66_s30, 3 }
   0x7   :  { %v98_v2 = vld [vmem:[%s74_s10] sm:$0xff]  ;;  %s68_s14 = scalar_lea.vmem %s530_s2, %s339_s11  ;;  %s80_s17 = scalar_lea.vmem %s532_s4, %s339_s11 }
   0x8   :  { %357 = vmatpush3.xpose.msk.msra.mxu0 %vm99_vm2, %v98_v2  ;;  %v97_v3 = vld [vmem:[%s68_s14] sm:$0xff]  ;;  %s85_s26 = scalar_lea.vmem %s533_s5, %s72_s27  ;;  %p349_p2 = scmp.gt.s32.totalorder %s478_s22, %s483_s24 }
   0x9   :  { %v176_v4 = vld [vmem:[%s80_s17] sm:$0xff]  ;;  %vm208_vm4 = vcmask (!%p349_p2), 64512  }
   0xa   :  { %179 = vperm.xlu0 %378, %v176_v4   ;;  %v344_v11 = vld [vmem:[%s85_s26] ss:$0 sm:$0xff]  ;;  %v224_v44 = vld [vmem:[#allocation3] sm:$0x1] (!%p349_p2) }
   0xb   :  { %359 = vmatmul.mubr.msk.f32.vlgmr.msra.gmra.mrb[0].mxu0 %vm99_vm2, %v97_v3  ;;  %v207_v41 = vld [vmem:[#allocation2] sm:$0x1] (!%p349_p2) }
  0x89   :  { %v180_v12 = vpop.permute.xlu0 %179 }
  0x8a   :  { %vm488_vm3 = vcmp.eq.s32.totalorder %v180_v12, %v344_v11 }
  0xde   :  { %v172_v5 = vpop.f32.mrb[0].mxu0 }
  0xdf   :  { %v186_v6 = vsub.f32 1.25, %v172_v5  ;;  %v191_v7 = vadd.f32 0.25, %v172_v5  ;;  %v360_v8 = vpop.f32.mrb[1].mxu0  ;;  %v345_v14 = vadd.f32 -0.75, %v172_v5  ;;  %v346_v16 = vadd.f32 -0.25, %v172_v5 }
  0xe1   :  { %v187_v9 = vmax.f32 %v186_v6, 0.0  ;;  %v192_v10 = vmax.f32 %v191_v7, 0.0 }
  0xe3   :  { %v188_v13 = vmul.f32 -32.0, %v187_v9  ;;  %v193_v15 = vmul.f32 32.0, %v192_v10 }
  0xe5   :  { %v190_v18 = vmul.f32 %v345_v14, %v188_v13  ;;  %v195_v19 = vmul.f32 %v346_v16, %v193_v15 }
  0xe7   :  { %v196_v20 = vsel %vm488_vm3, %v190_v18, %v195_v19 }
  0xe8   :  { %v197_v21 = vmul.f32 1.442695, %v196_v20 }
  0xea   :  { %379 = vpow2.f32 %v197_v21 }
  0xee   :  { %205 = sbr.rel (%p349_p2) target bundleno = 459 (0x1cb), region = 25 }
  0xf4   :  { %v380_v22 = vpop.eup %379 }
  0xf5   :  { %v206_v23 = vsel %vm488_vm3, %v380_v22, 0.0  ;;  %v223_v24 = vsel %vm488_vm3, 0.0, %v380_v22 }
  0xf6   :  { %v209_v25 = vsel %vm208_vm4, %v206_v23, 0.0  ;;  %v225_v26 = vsel %vm208_vm4, %v223_v24, 0.0 }
  0xf7   :  { %210 = vadd.xlane.f32.xlu0 %v209_v25 }
  0xfb   :  { %226 = vadd.xlane.f32.xlu0 %v225_v26 }
 0x184   :  { %v211_v27 = vpop.xlane.xlu0 %210 }
 0x185   :  { %v212_v28 = vrot.slane %v211_v27, 4 }
 0x187   :  { %v213_v29 = vadd.f32 %v212_v28, %v211_v27 }
 0x188   :  { %v227_v30 = vpop.xlane.xlu0 %226 }
 0x189   :  { %v214_v31 = vrot.slane %v213_v29, 2  ;;  %v228_v32 = vrot.slane %v227_v30, 4 }
 0x18b   :  { %v229_v33 = vadd.f32 %v228_v32, %v227_v30  ;;  %v215_v34 = vadd.f32 %v214_v31, %v213_v29 }
 0x18d   :  { %v230_v35 = vrot.slane %v229_v33, 2  ;;  %v216_v36 = vrot.slane %v215_v34, 1 }
 0x18f   :  { %v231_v37 = vadd.f32 %v230_v35, %v229_v33  ;;  %v217_v38 = vadd.f32 %v216_v36, %v215_v34 }
 0x191   :  { %361 = vpush %v217_v38  ;;  %v232_v39 = vrot.slane %v231_v37, 1 }
 0x193   :  { %v233_v40 = vadd.f32 %v232_v39, %v231_v37 }
 0x195   :  { %363 = vpush %v233_v40 }
 0x1c2   :  { %s362_s1 = spop %361 }
 0x1c3   :  { %v219_v42 = vstv %s362_s1 }
 0x1c4   :  { %v220_v43 = vadd.f32 %v219_v42, %v207_v41 }
 0x1c6   :  { %222 = vst.msk [vmem:[#allocation2] sm:$0x1] %vm93_vm0, %v220_v43  ;;  %s364_s5 = spop %363 }
 0x1c7   :  { %v235_v45 = vstv %s364_s5 }
 0x1c8   :  { %v236_v46 = vadd.f32 %v235_v45, %v224_v44 }
 0x1ca   :  { %237 = vst.msk [vmem:[#allocation3] sm:$0x1] %vm93_vm0, %v236_v46 }
 0x1cb PF:  { %p350_p3 = scmp.le.s32.totalorder %s478_s22, %s483_s24 }
 0x1cc   :  { %v243_v47 = vlaneseq (!%p350_p3)  ;;  %v245_v48 = vstv (!%p350_p3), %s352_s20  ;;  %v249_v49 = vstv (!%p350_p3), %s483_s24  ;;  %vm410_vm5 = vmmov (!%p350_p3), 1  }
 0x1cd   :  { %241 = sbr.rel (%p350_p3) target bundleno = 682 (0x2aa), region = 29  ;;  %vm270_vm6 = vmxor (!%p350_p3), %vm488_vm3, %vm410_vm5  ;;  %vm255_vm8 = vcmask (!%p350_p3), 64512   ;;  %v254_v8 = vld [vmem:[#allocation2] sm:$0x1] (!%p350_p3) }
 0x1ce   :  { %v244_v50 = vshrl.u32 (!%p350_p3), %v243_v47, 7  ;;  %v248_v51 = vand.u32 (!%p350_p3), 127, %v243_v47 }
 0x1d0   :  { %v246_v52 = vadd.s32 (!%p350_p3), %v245_v48, %v244_v50  ;;  %v250_v53 = vadd.s32 (!%p350_p3), %v249_v49, %v248_v51 }
 0x1d1   :  { %v273_v11 = vld [vmem:[#allocation3] sm:$0x1] (!%p350_p3) }
 0x1d2   :  { %vm251_vm7 = vcmp.lt.s32.totalorder (!%p350_p3), %v246_v52, %v250_v53 }
 0x1d3   :  { %vm252_vm9 = vmand (!%p350_p3), %vm488_vm3, %vm251_vm7 }
 0x1d4   :  { %v253_v54 = vsel %vm252_vm9, %v380_v22, 0.0  ;;  %vm271_vm10 = vmand %vm270_vm6, %vm251_vm7 }
 0x1d5   :  { %v256_v55 = vsel %vm255_vm8, %v253_v54, 0.0  ;;  %v272_v56 = vsel %vm271_vm10, %v380_v22, 0.0 }
 0x1d6   :  { %257 = vadd.xlane.f32.xlu0 %v256_v55  ;;  %v274_v57 = vsel %vm255_vm8, %v272_v56, 0.0 }
 0x1da   :  { %275 = vadd.xlane.f32.xlu0 %v274_v57 }
 0x263   :  { %v258_v58 = vpop.xlane.xlu0 %257 }
 0x264   :  { %v259_v59 = vrot.slane %v258_v58, 4 }
 0x266   :  { %v260_v60 = vadd.f32 %v259_v59, %v258_v58 }
 0x267   :  { %v276_v61 = vpop.xlane.xlu0 %275 }
 0x268   :  { %v261_v62 = vrot.slane %v260_v60, 2  ;;  %v277_v63 = vrot.slane %v276_v61, 4 }
 0x26a   :  { %v278_v0 = vadd.f32 %v277_v63, %v276_v61  ;;  %v262_v1 = vadd.f32 %v261_v62, %v260_v60 }
 0x26c   :  { %v279_v2 = vrot.slane %v278_v0, 2  ;;  %v263_v3 = vrot.slane %v262_v1, 1 }
 0x26e   :  { %v280_v4 = vadd.f32 %v279_v2, %v278_v0  ;;  %v264_v5 = vadd.f32 %v263_v3, %v262_v1 }
 0x270   :  { %365 = vpush %v264_v5  ;;  %v281_v6 = vrot.slane %v280_v4, 1 }
 0x272   :  { %v282_v7 = vadd.f32 %v281_v6, %v280_v4 }
 0x274   :  { %367 = vpush %v282_v7 }
 0x2a1   :  { %s366_s0 = spop %365 }
 0x2a2   :  { %v266_v9 = vstv %s366_s0 }
 0x2a3   :  { %v267_v10 = vadd.f32 %v266_v9, %v254_v8 }
 0x2a5   :  { %269 = vst.msk [vmem:[#allocation2] sm:$0x1] %vm93_vm0, %v267_v10  ;;  %s368_s29 = spop %367 }
 0x2a6   :  { %v284_v12 = vstv %s368_s29 }
 0x2a7   :  { %v285_v13 = vadd.f32 %v284_v12, %v273_v11 }
 0x2a9   :  { %286 = vst.msk [vmem:[#allocation3] sm:$0x1] %vm93_vm0, %v285_v13 }
 0x2aa PF:  { %s411_s8 = smov [#allocation7]  }
 0x2ab   :  { %s310_s9 = sshll.u32 %s411_s8, 4  ;;  %s311_s9 = int_to_ptr.vmem [resolvable:$true] %s310_s9 }
 0x2ac   :  { %v290_v14 = vld [vmem:[#allocation2] sm:$0x1]  ;;  %s383_s10 = scalar_lea.vmem %s311_s9, 16  ;;  %s387_s11 = scalar_lea.vmem %s311_s9, 32 }
 0x2ad   :  { %369 = vpush %v290_v14  ;;  %p384_p4 = scmp.ne.s32.totalorder %s311_s9, %s383_s10  ;;  %p388_p5 = scmp.lt.s32.totalorder %s311_s9, %s311_s9 }
 0x2ae   :  { %p389_p6 = scmp.lt.s32.totalorder %s387_s11, %s383_s10 }
 0x2b0   :  { %v294_v15 = vld [vmem:[#allocation3] sm:$0x1]  ;;  %p390_p7 = por %p389_p6, %p388_p5 }
 0x2b1   :  { %371 = vpush %v294_v15 }
 0x2b2   :  { %p391_p8 = pnand %p390_p7, %p384_p4 }
 0x2de   :  { %s370_s30 = spop %369 }
 0x2df   :  { %v293_v16 = vstv %s370_s30 }
 0x2e2   :  { %s372_s7 = spop %371 }
 0x2e3   :  { %v297_v17 = vstv %s372_s7 }
 0x2e4   :  { %v298_v18 = vmul.f32 %v297_v17, %v293_v16 }
 0x2e6   :  { %v299_v19 = vadd.f32 1.0, %v298_v18 }
 0x2e8   :  { %381 = vlog2.f32 %v299_v19 }
 0x2f2   :  { %v382_v20 = vpop.eup %381 }
 0x2f3   :  { %v301_v21 = vmul.f32 0.6931472, %v382_v20 }
 0x2f5   :  { %303 = vst.msk [vmem:[#allocation7] sm:$0x1] %vm93_vm0, %v301_v21 }
 0x2f6   :  { %394 = shalt.err (!%p391_p8)
}
 0x2f7   :  { %s395_s14 = scalar_lea.hbm %s534_s6, 16 }
 0x2f8   :  { %p396_p9 = scmp.ne.s32.totalorder %s534_s6, %s395_s14  ;;  %p399_p10 = scmp.lt.u32.totalorder %s395_s14, %s534_s6 }
 0x2fa   :  { %p401_p11 = pnand %p399_p10, %p396_p9 }
 0x2fc   :  { %404 = shalt.err (!%p401_p11)
}
 0x2fd   :  { %313 = dma.vmem_to_hbm [thread:$0]  %s311_s9, 16, %s534_s6, [#allocation8]  }
 0x2fe   :  { %405 = dma.done.wait [#allocation8], 16  }
 0x2ff   :  { %406 = vsyncadd [#allocation8], 4294967280 }
 0x300   :  { %317 = vsyncpa [#allocation8], 1 }

</bundles_post_ra>
